<compile_context>
chip_gen: v7x
topology: tpu7x:2x2x1
jax: 0.10.0
libtpu: 0.0.40
codegen_flags: <defaults>
</compile_context>

<pallas_src>
import jax
import jax.numpy as jnp
from jax.experimental import pallas as pl
from jax.experimental.pallas import tpu as pltpu


def _round_up(x, m):
    return (x + m - 1) // m * m


def _score_kernel(h_ref, t_ref, r_ref, z_ref, wd_ref, bd_ref, o_ref):
    # h/t/r: (tm, E); z: (tm, 4E); wd: (4E, E); bd: (1, E); o: (tm//128, 128)
    enc = jnp.dot(z_ref[...], wd_ref[...], preferred_element_type=jnp.float32)
    diff = h_ref[...] + r_ref[...] - t_ref[...] + enc + bd_ref[...]
    sq = jnp.sum(diff * diff, axis=-1)                     # (tm,) per-row squared norm
    # Sublane+lane dense store: relayout per-row results into an (tm/128, 128) tile.
    # Rows of a partial last tile beyond M hold garbage; they never mix with valid rows
    # (all ops are per-row) and the wrapper discards them.
    o_ref[...] = (-jnp.sqrt(sq)).reshape(o_ref.shape)


def score_calculator(h, t, r, pos_num, z, wh, bh, wt, bt, *, tm=8192):
    """
    h, t, r : (B, N, 1, E)  float32
    z       : (B, N, 4E)    float32
    wh, wt  : (E, 4E)  (PyTorch nn.Linear weight layout)
    bh, bt  : (E,)
    returns : p_score (B, pos_num, 1), n_score (B, N - pos_num, 1)
    """
    B, N, _, E = h.shape
    F = 4 * E
    M = B * N

    h2 = h.reshape(M, E).astype(jnp.float32)
    t2 = t.reshape(M, E).astype(jnp.float32)
    r2 = r.reshape(M, E).astype(jnp.float32)
    z2 = z.reshape(M, F).astype(jnp.float32)

    # Fused encoder: enc_h - enc_t = z @ (Wh - Wt)^T + (bh - bt)
    wd = (wh - wt).T.astype(jnp.float32)           # (4E, E)
    bd = (bh - bt).reshape(1, E).astype(jnp.float32)

    # Row-tile size: multiple of 128 (so output tiles are (tm/128, 128) dense), and at
    # most ceil(M/2) so there are >= 2 tiles whenever possible (v7x megacore sharding).
    tm_eff = _round_up(max(1, min(tm, -(-M // 2))), 128)
    num_tiles = -(-M // tm_eff)                    # pl.cdiv; last tile may be partial
    rows_per_tile = tm_eff // 128

    # VMEM budget from the *lane-padded* footprint:
    #   per row, per buffer: 3 * pad128(E) + pad128(F) f32 lanes; double-buffered.
    lane = lambda d: _round_up(d, 128)
    bytes_per_row = (3 * lane(E) + lane(F)) * 4
    vmem_bytes = 2 * tm_eff * bytes_per_row                      # double-buffered inputs
    vmem_bytes += 2 * rows_per_tile * 128 * 4                    # double-buffered output
    vmem_bytes += 2 * _round_up(F, 8) * lane(E) * 4 + 128 * 128  # resident weights/bias
    vmem_limit = max(vmem_bytes + 2 * 1024 * 1024, 32 * 1024 * 1024)

    row_spec = lambda cols: pl.BlockSpec((tm_eff, cols), lambda i: (i, 0))
    resident = lambda shape: pl.BlockSpec(shape, lambda i: (0, 0))   # stays in VMEM

    cost = pl.CostEstimate(
        flops=2 * M * F * E,
        transcendentals=M,
        bytes_accessed=(M * (3 * E + F + 1) + F * E + E) * 4,
    )

    score_tiles = pl.pallas_call(
        _score_kernel,
        out_shape=jax.ShapeDtypeStruct((num_tiles * rows_per_tile, 128), jnp.float32),
        grid=(num_tiles,),
        in_specs=[
            row_spec(E),          # h
            row_spec(E),          # t
            row_spec(E),          # r
            row_spec(F),          # z
            resident((F, E)),     # (Wh - Wt)^T
            resident((1, E)),     # bh - bt
        ],
        out_specs=pl.BlockSpec((rows_per_tile, 128), lambda i: (i, 0)),
        compiler_params=pltpu.CompilerParams(
            dimension_semantics=("parallel",),
            vmem_limit_bytes=vmem_limit,
        ),
        cost_estimate=cost,
    )(h2, t2, r2, z2, wd, bd)

    # Flatten tiles back to row order and drop the (discarded) tail-tile garbage rows.
    score = score_tiles.reshape(-1)[:M].reshape(B, N, 1)
    p_score = score[:, :pos_num]
    n_score = score[:, pos_num:]
    return p_score, n_score


def _reference(h, t, r, pos_num, z, wh, bh, wt, bt):
    z_unsq = z[:, :, None, :]                                    # (B, N, 1, 4E)
    enc_h = jnp.einsum("bnqf,ef->bnqe", z_unsq, wh) + bh
    enc_t = jnp.einsum("bnqf,ef->bnqe", z_unsq, wt) + bt
    hh = h + enc_h
    tt = t + enc_t
    score = -jnp.sqrt(jnp.sum((hh + r - tt) ** 2, axis=-1))      # (B, N, 1)
    return score[:, :pos_num], score[:, pos_num:]


def _make_inputs(key, B, N, E):
    keys = jax.random.split(key, 4)
    h = jax.random.normal(keys[0], (B, N, 1, E), jnp.float32)
    t = jax.random.normal(keys[1], (B, N, 1, E), jnp.float32)
    r = jax.random.normal(keys[2], (B, N, 1, E), jnp.float32)
    z = jax.random.normal(keys[3], (B, N, 4 * E), jnp.float32)
    return h, t, r, z


if __name__ == "__main__":
    key = jax.random.PRNGKey(0)
    B, N, E = 2, 8, 32          # emb_dim = 32 -> 4*emb_dim = 128
    pos_num = 3

    key_in, key_w, key_big = jax.random.split(key, 3)

    h, t, r, z = _make_inputs(key_in, B, N, E)

    # Deterministic "Linear" parameters (PyTorch layout: weight (out, in) = (E, 4E))
    wkeys = jax.random.split(key_w, 4)
    lim = 1.0 / jnp.sqrt(4.0 * E)
    wh = jax.random.uniform(wkeys[0], (E, 4 * E), jnp.float32, -lim, lim)
    bh = jax.random.uniform(wkeys[1], (E,), jnp.float32, -lim, lim)
    wt = jax.random.uniform(wkeys[2], (E, 4 * E), jnp.float32, -lim, lim)
    bt = jax.random.uniform(wkeys[3], (E,), jnp.float32, -lim, lim)

    # --- small single-tile case (M=16 rows -> one partial 128-row tile) ---
    p_score, n_score = score_calculator(h, t, r, pos_num, z, wh, bh, wt, bt)
    jax.block_until_ready((p_score, n_score))

    p_ref, n_ref = _reference(h, t, r, pos_num, z, wh, bh, wt, bt)
    assert p_score.shape == (B, pos_num, 1) and n_score.shape == (B, N - pos_num, 1)
    assert jnp.allclose(p_score, p_ref, atol=1e-4, rtol=1e-4)
    assert jnp.allclose(n_score, n_ref, atol=1e-4, rtol=1e-4)

    # --- multi-tile case: M=2200 rows, tm=1024 -> 3 tiles (last partial), 8-sublane
    #     deep output blocks, no wrapper-side padding ---
    B2, N2, pos2 = 2, 1100, 100
    h2, t2, r2, z2 = _make_inputs(key_big, B2, N2, E)
    p2, n2 = score_calculator(h2, t2, r2, pos2, z2, wh, bh, wt, bt, tm=1024)
    jax.block_until_ready((p2, n2))
    p2_ref, n2_ref = _reference(h2, t2, r2, pos2, z2, wh, bh, wt, bt)
    assert p2.shape == (B2, pos2, 1) and n2.shape == (B2, N2 - pos2, 1)
    assert jnp.allclose(p2, p2_ref, atol=1e-4, rtol=1e-4)
    assert jnp.allclose(n2, n2_ref, atol=1e-4, rtol=1e-4)

    print("KERNEL_OK")
</pallas_src>

<mosaic_0001>
module attributes {stable_mosaic.version = 11 : i64} {
  func.func @_score_kernel(%arg0: i32, %arg1: memref<128x32xf32, #tpu.memory_space<vmem>>, %arg2: memref<128x32xf32, #tpu.memory_space<vmem>>, %arg3: memref<128x32xf32, #tpu.memory_space<vmem>>, %arg4: memref<128x128xf32, #tpu.memory_space<vmem>>, %arg5: memref<128x32xf32, #tpu.memory_space<vmem>>, %arg6: memref<1x32xf32, #tpu.memory_space<vmem>>, %arg7: memref<1x128xf32, #tpu.memory_space<vmem>>) attributes {dimension_semantics = [#tpu.dimension_semantics<parallel>], iteration_bounds = array<i64: 1>, scalar_prefetch = 0 : i64, scratch_operands = 0 : i64, tpu.core_type = #tpu.core_type<tc>, window_params = [{transform_indices = @transform_0, window_bounds = array<i64: 128, 32>}, {transform_indices = @transform_1, window_bounds = array<i64: 128, 32>}, {transform_indices = @transform_2, window_bounds = array<i64: 128, 32>}, {transform_indices = @transform_3, window_bounds = array<i64: 128, 128>}, {pipeline_mode = #tpu.pipeline_mode<synchronous>, transform_indices = @transform_4, window_bounds = array<i64: 128, 32>}, {pipeline_mode = #tpu.pipeline_mode<synchronous>, transform_indices = @transform_5, window_bounds = array<i64: 1, 32>}, {transform_indices = @transform_6, window_bounds = array<i64: 1, 128>}]} {
    %c0 = arith.constant 0 : index
    %c0_0 = arith.constant 0 : index
    %0 = vector.load %arg4[%c0, %c0_0] : memref<128x128xf32, #tpu.memory_space<vmem>>, vector<128x128xf32>
    %c0_1 = arith.constant 0 : index
    %c0_2 = arith.constant 0 : index
    %1 = vector.load %arg5[%c0_1, %c0_2] : memref<128x32xf32, #tpu.memory_space<vmem>>, vector<128x32xf32>
    %cst = arith.constant dense<0.000000e+00> : vector<128x32xf32>
    %2 = tpu.matmul %0, %1, %cst {dimension_numbers = #tpu.dot_dimension_numbers<[1], [0], [0], [1], [0, 0, 1, 1], [], []>} : vector<128x128xf32>, vector<128x32xf32>, vector<128x32xf32> -> vector<128x32xf32>
    %c0_3 = arith.constant 0 : index
    %c0_4 = arith.constant 0 : index
    %3 = vector.load %arg1[%c0_3, %c0_4] : memref<128x32xf32, #tpu.memory_space<vmem>>, vector<128x32xf32>
    %c0_5 = arith.constant 0 : index
    %c0_6 = arith.constant 0 : index
    %4 = vector.load %arg3[%c0_5, %c0_6] : memref<128x32xf32, #tpu.memory_space<vmem>>, vector<128x32xf32>
    %5 = arith.addf %3, %4 : vector<128x32xf32>
    %c0_7 = arith.constant 0 : index
    %c0_8 = arith.constant 0 : index
    %6 = vector.load %arg2[%c0_7, %c0_8] : memref<128x32xf32, #tpu.memory_space<vmem>>, vector<128x32xf32>
    %7 = arith.subf %5, %6 : vector<128x32xf32>
    %8 = arith.addf %7, %2 : vector<128x32xf32>
    %c0_9 = arith.constant 0 : index
    %c0_10 = arith.constant 0 : index
    %9 = vector.load %arg6[%c0_9, %c0_10] : memref<1x32xf32, #tpu.memory_space<vmem>>, vector<1x32xf32>
    %10 = vector.broadcast %9 : vector<1x32xf32> to vector<128x32xf32>
    %11 = arith.addf %8, %10 : vector<128x32xf32>
    %12 = arith.mulf %11, %11 : vector<128x32xf32>
    %cst_11 = arith.constant dense<0.000000e+00> : vector<128xf32>
    %13 = vector.multi_reduction <add>, %12, %cst_11 [1] : vector<128x32xf32> to vector<128xf32>
    %14 = math.sqrt %13 : vector<128xf32>
    %cst_12 = arith.constant 0.000000e+00 : f32
    %15 = vector.broadcast %cst_12 : f32 to vector<128xf32>
    %16 = arith.subf %15, %14 : vector<128xf32>
    %17 = vector.shape_cast %16 : vector<128xf32> to vector<1x128xf32>
    %c0_13 = arith.constant 0 : index
    %c0_14 = arith.constant 0 : index
    %18 = vector.load %arg7[%c0_13, %c0_14] : memref<1x128xf32, #tpu.memory_space<vmem>>, vector<1x128xf32>
    tpu.vector_store %arg7[%c0_13, %c0_14], %17 {strides = array<i32>} : memref<1x128xf32, #tpu.memory_space<vmem>>, vector<1x128xf32>,
    return
  }
  func.func @transform_0(%arg0: i32) -> (i32, i32) {
    %c0_i32 = arith.constant 0 : i32
    %c0_i32_0 = arith.constant 0 : i32
    return %arg0, %c0_i32 : i32, i32
  }
  func.func @transform_1(%arg0: i32) -> (i32, i32) {
    %c0_i32 = arith.constant 0 : i32
    %c0_i32_0 = arith.constant 0 : i32
    return %arg0, %c0_i32 : i32, i32
  }
  func.func @transform_2(%arg0: i32) -> (i32, i32) {
    %c0_i32 = arith.constant 0 : i32
    %c0_i32_0 = arith.constant 0 : i32
    return %arg0, %c0_i32 : i32, i32
  }
  func.func @transform_3(%arg0: i32) -> (i32, i32) {
    %c0_i32 = arith.constant 0 : i32
    %c0_i32_0 = arith.constant 0 : i32
    return %arg0, %c0_i32 : i32, i32
  }
  func.func @transform_4(%arg0: i32) -> (i32, i32) {
    %c0_i32 = arith.constant 0 : i32
    %c0_i32_0 = arith.constant 0 : i32
    %c0_i32_1 = arith.constant 0 : i32
    return %c0_i32, %c0_i32_0 : i32, i32
  }
  func.func @transform_5(%arg0: i32) -> (i32, i32) {
    %c0_i32 = arith.constant 0 : i32
    %c0_i32_0 = arith.constant 0 : i32
    %c0_i32_1 = arith.constant 0 : i32
    return %c0_i32, %c0_i32_0 : i32, i32
  }
  func.func @transform_6(%arg0: i32) -> (i32, i32) {
    %c0_i32 = arith.constant 0 : i32
    %c0_i32_0 = arith.constant 0 : i32
    return %arg0, %c0_i32 : i32, i32
  }
}

</mosaic_0001>

<bundles_post_ra>
// kernel: tpu_custom_call.1
= control target key start
LH: loop header
LB: loop body
LE: loop exit
PB: predicated region body
PF: predicated region fallthrough
CT: control target
= control target key end

     0   :  { %s1497_s0 = inlined_call_operand.vmem [shape: f32[16,32], index: 0, kind: input, shape index: {}]   ;;  %s1498_s1 = inlined_call_operand.vmem [shape: f32[16,32], index: 1, kind: input, shape index: {}]   ;;  %s1499_s2 = inlined_call_operand.vmem [shape: f32[16,32], index: 2, kind: input, shape index: {}]   ;;  %s1500_s3 = inlined_call_operand.vmem [shape: f32[16,128], index: 3, kind: input, shape index: {}]   ;;  %s1501_s4 = inlined_call_operand.vmem [shape: f32[128,32], index: 4, kind: input, shape index: {}]   ;;  %s1502_s5 = inlined_call_operand.vmem [shape: f32[1,32], index: 5, kind: input, shape index: {}]   ;;  %s1503_s6 = inlined_call_operand.hbm [shape: f32[1,128], index: 6, kind: output, shape index: {}]  }
   0x1   :  { %v40_v0 = vld [vmem:[%s1501_s4] sm:$0xff]  ;;  %v41_v1 = vld [vmem:[%s1501_s4 + $0x8] sm:$0xff]  ;;  %v42_v2 = vld [vmem:[%s1501_s4 + $0x10] sm:$0xff] }
   0x2   :  { %v745_v3 = vpack.c.bf16 %v41_v1, %v40_v0  ;;  %v43_v4 = vld [vmem:[%s1501_s4 + $0x18] sm:$0xff]  ;;  %v44_v6 = vld [vmem:[%s1501_s4 + $0x20] sm:$0xff]  ;;  %v45_v7 = vld [vmem:[%s1501_s4 + $0x28] sm:$0xff] }
   0x3   :  { %v749_v5 = vpack.c.bf16 %v43_v4, %v42_v2  ;;  %v753_v8 = vpack.c.bf16 %v45_v7, %v44_v6  ;;  %v24_v9 = vld [vmem:[%s1500_s3] sm:$0xff]  ;;  %v46_v11 = vld [vmem:[%s1501_s4 + $0x30] sm:$0xff]  ;;  %v47_v12 = vld [vmem:[%s1501_s4 + $0x38] sm:$0xff] }
   0x4   :  { %746 = vmatprep.subr.bf16.mxu0 %v745_v3  ;;  %777 = vmatprep.subr.bf16.mxu1 %v745_v3  ;;  %v32_v10 = vld [vmem:[%s1500_s3 + $0x40] sm:$0xff]  ;;  %v757_v13 = vpack.c.bf16 %v47_v12, %v46_v11  ;;  %v49_v15 = vld [vmem:[%s1501_s4 + $0x48] sm:$0xff] }
   0x5   :  { %748 = vmatpush3.bf16.msra.mxu0 %v745_v3  ;;  %785 = vmatpush3.bf16.msra.mxu1 %v745_v3  ;;  %v48_v14 = vld [vmem:[%s1501_s4 + $0x40] sm:$0xff] }
   0x6   :  { %750 = vmatprep.subr.bf16.mxu0 %v749_v5  ;;  %778 = vmatprep.subr.bf16.mxu1 %v749_v5 }
   0x7   :  { %721 = vmatprep.mubr.f32.mxu0 %v24_v9  ;;  %733 = vmatprep.mubr.f32.mxu1 %v32_v10 }
   0x9   :  { %752 = vmatpush3.bf16.msra.mxu0 %v749_v5  ;;  %786 = vmatpush3.bf16.msra.mxu1 %v749_v5 }
   0xa   :  { %754 = vmatprep.subr.bf16.mxu0 %v753_v8  ;;  %779 = vmatprep.subr.bf16.mxu1 %v753_v8 }
   0xb   :  { %11 = vsyncpa [#allocation3], 0  ;;  %v761_v16 = vpack.c.bf16 %v49_v15, %v48_v14  ;;  %v50_v17 = vld [vmem:[%s1501_s4 + $0x50] sm:$0xff]  ;;  %v51_v18 = vld [vmem:[%s1501_s4 + $0x58] sm:$0xff]  ;;  %vm336_vm0 = vcmask 261120   ;;  %vm540_vm12 = vcmask 130112  }
   0xc   :  { %v765_v19 = vpack.c.bf16 %v51_v18, %v50_v17  ;;  %v52_v20 = vld [vmem:[%s1501_s4 + $0x60] sm:$0xff]  ;;  %v53_v21 = vld [vmem:[%s1501_s4 + $0x68] sm:$0xff]  ;;  %v54_v23 = vld [vmem:[%s1501_s4 + $0x70] sm:$0xff] }
   0xd   :  { %756 = vmatpush3.bf16.msra.mxu0 %v753_v8  ;;  %787 = vmatpush3.bf16.msra.mxu1 %v753_v8  ;;  %v769_v22 = vpack.c.bf16 %v53_v21, %v52_v20  ;;  %v55_v24 = vld [vmem:[%s1501_s4 + $0x78] sm:$0xff]  ;;  %v25_v26 = vld [vmem:[%s1500_s3 + $0x8] sm:$0xff]  ;;  %v26_v28 = vld [vmem:[%s1500_s3 + $0x10] sm:$0xff] }
   0xe   :  { %758 = vmatprep.subr.bf16.mxu0 %v757_v13  ;;  %780 = vmatprep.subr.bf16.mxu1 %v757_v13  ;;  %v773_v25 = vpack.c.bf16 %v55_v24, %v54_v23  ;;  %v33_v27 = vld [vmem:[%s1500_s3 + $0x48] sm:$0xff]  ;;  %v34_v29 = vld [vmem:[%s1500_s3 + $0x50] sm:$0xff]  ;;  %v27_v30 = vld [vmem:[%s1500_s3 + $0x18] sm:$0xff] }
   0xf   :  { %v35_v31 = vld [vmem:[%s1500_s3 + $0x58] sm:$0xff]  ;;  %v28_v32 = vld [vmem:[%s1500_s3 + $0x20] sm:$0xff]  ;;  %v29_v34 = vld [vmem:[%s1500_s3 + $0x28] sm:$0xff] }
  0x10   :  { %v36_v33 = vld [vmem:[%s1500_s3 + $0x60] sm:$0xff]  ;;  %v37_v35 = vld [vmem:[%s1500_s3 + $0x68] sm:$0xff]  ;;  %v30_v36 = vld [vmem:[%s1500_s3 + $0x30] sm:$0xff] }
  0x11   :  { %760 = vmatpush3.bf16.msra.mxu0 %v757_v13  ;;  %788 = vmatpush3.bf16.msra.mxu1 %v757_v13  ;;  %v38_v37 = vld [vmem:[%s1500_s3 + $0x70] sm:$0xff]  ;;  %v31_v38 = vld [vmem:[%s1500_s3 + $0x38] sm:$0xff]  ;;  %v202_v40 = vld [vmem:[%s1497_s0 + $0x8] sm:$0xff] }
  0x12   :  { %762 = vmatprep.subr.bf16.mxu0 %v761_v16  ;;  %781 = vmatprep.subr.bf16.mxu1 %v761_v16  ;;  %v39_v39 = vld [vmem:[%s1500_s3 + $0x78] sm:$0xff]  ;;  %v218_v41 = vld [vmem:[%s1499_s2 + $0x8] sm:$0xff]  ;;  %v201_v44 = vld [vmem:[%s1497_s0] sm:$0xff] }
  0x13   :  { %v210_v42 = vld [vmem:[%s1497_s0 + $0x48] sm:$0xff]  ;;  %v217_v45 = vld [vmem:[%s1499_s2] sm:$0xff]  ;;  %v234_v50 = vadd.f32 %v218_v41, %v202_v40  ;;  %v204_v54 = vld [vmem:[%s1497_s0 + $0x18] sm:$0xff] }
  0x14   :  { %v226_v43 = vld [vmem:[%s1499_s2 + $0x48] sm:$0xff]  ;;  %v209_v46 = vld [vmem:[%s1497_s0 + $0x40] sm:$0xff]  ;;  %v220_v55 = vld [vmem:[%s1499_s2 + $0x18] sm:$0xff]  ;;  %v233_v57 = vadd.f32 %v217_v45, %v201_v44 }
  0x15   :  { %764 = vmatpush3.bf16.msra.mxu0 %v761_v16  ;;  %789 = vmatpush3.bf16.msra.mxu1 %v761_v16  ;;  %v225_v47 = vld [vmem:[%s1499_s2 + $0x40] sm:$0xff]  ;;  %v250_v48 = vld [vmem:[%s1498_s1 + $0x8] sm:$0xff]  ;;  %v242_v51 = vadd.f32 %v226_v43, %v210_v42  ;;  %v203_v56 = vld [vmem:[%s1497_s0 + $0x10] sm:$0xff]  ;;  %v236_v1 = vadd.f32 %v220_v55, %v204_v54 }
  0x16   :  { %766 = vmatprep.subr.bf16.mxu0 %v765_v19  ;;  %782 = vmatprep.subr.bf16.mxu1 %v765_v19  ;;  %v258_v49 = vld [vmem:[%s1498_s1 + $0x48] sm:$0xff]  ;;  %v249_v52 = vld [vmem:[%s1498_s1] sm:$0xff]  ;;  %v241_v58 = vadd.f32 %v225_v47, %v209_v46  ;;  %v219_v59 = vld [vmem:[%s1499_s2 + $0x10] sm:$0xff]  ;;  %v266_v5 = vsub.f32 %v234_v50, %v250_v48 }
  0x17   :  { %v257_v53 = vld [vmem:[%s1498_s1 + $0x40] sm:$0xff]  ;;  %v212_v60 = vld [vmem:[%s1497_s0 + $0x58] sm:$0xff]  ;;  %v211_v62 = vld [vmem:[%s1497_s0 + $0x50] sm:$0xff]  ;;  %v274_v6 = vsub.f32 %v242_v51, %v258_v49  ;;  %v235_v8 = vadd.f32 %v219_v59, %v203_v56  ;;  %v265_v10 = vsub.f32 %v233_v57, %v249_v52 }
  0x18   :  { %v228_v61 = vld [vmem:[%s1499_s2 + $0x58] sm:$0xff]  ;;  %v227_v63 = vld [vmem:[%s1499_s2 + $0x50] sm:$0xff]  ;;  %v206_v0 = vld [vmem:[%s1497_s0 + $0x28] sm:$0xff]  ;;  %v273_v12 = vsub.f32 %v241_v58, %v257_v53 }
  0x19   :  { %768 = vmatpush3.bf16.msra.mxu0 %v765_v19  ;;  %790 = vmatpush3.bf16.msra.mxu1 %v765_v19  ;;  %v222_v2 = vld [vmem:[%s1499_s2 + $0x28] sm:$0xff]  ;;  %v205_v3 = vld [vmem:[%s1497_s0 + $0x20] sm:$0xff]  ;;  %v252_v7 = vld [vmem:[%s1498_s1 + $0x18] sm:$0xff]  ;;  %v244_v9 = vadd.f32 %v228_v61, %v212_v60  ;;  %v243_v15 = vadd.f32 %v227_v63, %v211_v62 }
  0x1a   :  { %770 = vmatprep.subr.bf16.mxu0 %v769_v22  ;;  %783 = vmatprep.subr.bf16.mxu1 %v769_v22  ;;  %v221_v4 = vld [vmem:[%s1499_s2 + $0x20] sm:$0xff]  ;;  %v251_v13 = vld [vmem:[%s1498_s1 + $0x10] sm:$0xff]  ;;  %v260_v14 = vld [vmem:[%s1498_s1 + $0x58] sm:$0xff]  ;;  %v238_v17 = vadd.f32 %v222_v2, %v206_v0  ;;  %v268_v23 = vsub.f32 %v236_v1, %v252_v7 }
  0x1b   :  { %v1060_v11 = vld [vmem:[%s1502_s5] ss:$0 sm:$0xff]  ;;  %v259_v16 = vld [vmem:[%s1498_s1 + $0x50] sm:$0xff]  ;;  %v254_v18 = vld [vmem:[%s1498_s1 + $0x28] sm:$0xff]  ;;  %v1074_v19 = vadd.f32 %v221_v4, %v205_v3 }
  0x1c   :  { %v1079_v20 = vld [vmem:[%s1498_s1 + $0x20] sm:$0xff]  ;;  %v208_v24 = vld [vmem:[%s1497_s0 + $0x38] sm:$0xff]  ;;  %v270_v41 = vsub.f32 %v238_v17, %v254_v18  ;;  %v255_v2 = vld [vmem:[%s1498_s1 + $0x30] sm:$0xff] }
  0x1d   :  { %772 = vmatpush3.bf16.msra.mxu0 %v769_v22  ;;  %791 = vmatpush3.bf16.msra.mxu1 %v769_v22  ;;  %v269_v42 = vsub.f32 %v1074_v19, %v1079_v20  ;;  %v213_v55 = vld [vmem:[%s1497_s0 + $0x60] sm:$0xff]  ;;  %v256_v61 = vld [vmem:[%s1498_s1 + $0x38] sm:$0xff]  ;;  %v262_v3 = vld [vmem:[%s1498_s1 + $0x68] sm:$0xff] }
  0x1e   :  { %774 = vmatprep.subr.bf16.mxu0 %v773_v25  ;;  %784 = vmatprep.subr.bf16.mxu1 %v773_v25  ;;  %v229_v56 = vld [vmem:[%s1499_s2 + $0x60] sm:$0xff]  ;;  %v215_v17 = vld [vmem:[%s1497_s0 + $0x70] sm:$0xff] }
  0x1f   :  { %v261_v7 = vld [vmem:[%s1498_s1 + $0x60] sm:$0xff]  ;;  %v231_v18 = vld [vmem:[%s1499_s2 + $0x70] sm:$0xff] }
  0x21   :  { %776 = vmatpush3.bf16.msra.mxu0 %v773_v25  ;;  %792 = vmatpush3.bf16.msra.mxu1 %v773_v25  ;;  %v224_v25 = vld [vmem:[%s1499_s2 + $0x38] sm:$0xff] }
  0x22   :  { %v240_v46 = vadd.f32 %v224_v25, %v208_v24 }
  0x24   :  { %722 = vmatmul.mubr.f32.vlgmr.msra.gmra.mrb[0].mxu0 %v25_v26  ;;  %734 = vmatmul.mubr.f32.vlgmr.msra.gmra.mrb[0].mxu1 %v33_v27  ;;  %v207_v26 = vld [vmem:[%s1497_s0 + $0x30] sm:$0xff] }
  0x25   :  { %724 = vmatprep.mubr.f32.mxu0 %v26_v28  ;;  %736 = vmatprep.mubr.f32.mxu1 %v34_v29 }
  0x28   :  { %725 = vmatmul.mubr.f32.gmra.mrb[2].mxu0 %v27_v30  ;;  %737 = vmatmul.mubr.f32.gmra.mrb[2].mxu1 %v35_v31  ;;  %v267_v31 = vsub.f32 %v235_v8, %v251_v13  ;;  %v216_v8 = vld [vmem:[%s1497_s0 + $0x78] sm:$0xff] }
  0x29   :  { %727 = vmatprep.mubr.f32.mxu0 %v28_v32  ;;  %739 = vmatprep.mubr.f32.mxu1 %v36_v33  ;;  %v276_v32 = vsub.f32 %v244_v9, %v260_v14  ;;  %v223_v33 = vld [vmem:[%s1499_s2 + $0x30] sm:$0xff]  ;;  %v272_v14 = vsub.f32 %v240_v46, %v256_v61 }
  0x2a   :  { %v239_v47 = vadd.f32 %v223_v33, %v207_v26 }
  0x2c   :  { %728 = vmatmul.mubr.f32.gmra.mrb[4].mxu0 %v29_v34  ;;  %740 = vmatmul.mubr.f32.gmra.mrb[4].mxu1 %v37_v35  ;;  %v214_v34 = vld [vmem:[%s1497_s0 + $0x68] sm:$0xff] }
  0x2d   :  { %730 = vmatprep.mubr.f32.mxu0 %v30_v36  ;;  %742 = vmatprep.mubr.f32.mxu1 %v38_v37  ;;  %v230_v35 = vld [vmem:[%s1499_s2 + $0x68] sm:$0xff] }
  0x2e   :  { %v1104_v48 = vadd.f32 %v230_v35, %v214_v34 }
  0x30   :  { %731 = vmatmul.mubr.f32.gmra.mrb[6].mxu0 %v31_v38  ;;  %743 = vmatmul.mubr.f32.gmra.mrb[6].mxu1 %v39_v39  ;;  %v275_v38 = vsub.f32 %v243_v15, %v259_v16  ;;  %v232_v16 = vld [vmem:[%s1499_s2 + $0x78] sm:$0xff] }
  0xf7   :  { %v723_v21 = vpop.f32.mrb[0].mxu0  ;;  %v735_v22 = vpop.f32.mrb[0].mxu1 }
  0xf8   :  { %v282_v27 = vadd.f32 %v723_v21, %v266_v5  ;;  %v290_v28 = vadd.f32 %v735_v22, %v274_v6  ;;  %v122_v29 = vpop.f32.mrb[1].mxu0  ;;  %v162_v30 = vpop.f32.mrb[1].mxu1  ;;  %v245_v6 = vadd.f32 %v229_v56, %v213_v55  ;;  %v271_v21 = vsub.f32 %v239_v47, %v255_v2 }
  0xf9   :  { %v281_v36 = vadd.f32 %v265_v10, %v122_v29  ;;  %v289_v37 = vadd.f32 %v273_v12, %v162_v30  ;;  %v278_v22 = vsub.f32 %v1104_v48, %v262_v3  ;;  %v248_v30 = vadd.f32 %v232_v16, %v216_v8 }
  0xfa   :  { %v313_v39 = vadd.f32 %v1060_v11, %v290_v28  ;;  %v305_v40 = vadd.f32 %v1060_v11, %v282_v27  ;;  %v277_v28 = vsub.f32 %v245_v6, %v261_v7 }
  0xfb   :  { %v304_v43 = vadd.f32 %v1060_v11, %v281_v36  ;;  %v726_v44 = vpop.f32.mrb[2].mxu0  ;;  %v738_v45 = vpop.f32.mrb[2].mxu1  ;;  %v312_v57 = vadd.f32 %v1060_v11, %v289_v37  ;;  %v264_v37 = vld [vmem:[%s1498_s1 + $0x78] sm:$0xff] }
  0xfc   :  { %v284_v49 = vadd.f32 %v726_v44, %v268_v23  ;;  %v132_v50 = vpop.f32.mrb[3].mxu0  ;;  %v329_v51 = vmul.f32 %v313_v39, %v313_v39  ;;  %v292_v52 = vadd.f32 %v738_v45, %v276_v32  ;;  %v321_v53 = vmul.f32 %v305_v40, %v305_v40  ;;  %v172_v54 = vpop.f32.mrb[3].mxu1  ;;  %v263_v39 = vld [vmem:[%s1498_s1 + $0x70] sm:$0xff]  ;;  %s850_s1 = smov [#allocation2]  }
  0xfd   :  { %v283_v58 = vadd.f32 %v267_v31, %v132_v50  ;;  %v291_v59 = vadd.f32 %v275_v38, %v172_v54  ;;  %v320_v60 = vmul.f32 %v304_v43, %v304_v43  ;;  %v328_v20 = vmul.f32 %v312_v57, %v312_v57  ;;  %s648_s26 = sshll.u32 %s850_s1, 4  ;;  %s649_s26 = int_to_ptr.vmem [resolvable:$true] %s648_s26 }
  0xfe   :  { %v307_v62 = vadd.f32 %v1060_v11, %v284_v49  ;;  %v364_v63 = vsel %vm336_vm0, %v329_v51, 0.0  ;;  %v315_v0 = vadd.f32 %v1060_v11, %v292_v52  ;;  %v340_v1 = vsel %vm336_vm0, %v321_v53, 0.0  ;;  %s826_s27 = scalar_lea.vmem %s649_s26, 16  ;;  %s830_s28 = scalar_lea.vmem %s649_s26, 32 }
  0xff   :  { %365 = vadd.xlane.f32.xlu1 %v364_v63  ;;  %341 = vadd.xlane.f32.xlu0 %v340_v1  ;;  %v729_v4 = vpop.f32.mrb[4].mxu0  ;;  %v741_v5 = vpop.f32.mrb[4].mxu1  ;;  %v306_v23 = vadd.f32 %v1060_v11, %v283_v58  ;;  %v314_v24 = vadd.f32 %v1060_v11, %v291_v59  ;;  %v337_v25 = vsel %vm336_vm0, %v320_v60, 0.0  ;;  %v247_v31 = vadd.f32 %v231_v18, %v215_v17  ;;  %p827_p0 = scmp.ne.s32.totalorder %s649_s26, %s826_s27  ;;  %p831_p1 = scmp.lt.s32.totalorder %s649_s26, %s649_s26 }
 0x100   :  { %v323_v9 = vmul.f32 %v307_v62, %v307_v62  ;;  %v286_v10 = vadd.f32 %v729_v4, %v270_v41  ;;  %v142_v12 = vpop.f32.mrb[5].mxu0  ;;  %v331_v13 = vmul.f32 %v315_v0, %v315_v0  ;;  %v182_v15 = vpop.f32.mrb[5].mxu1  ;;  %v361_v41 = vsel %vm336_vm0, %v328_v20, 0.0  ;;  %p832_p2 = scmp.lt.s32.totalorder %s830_s28, %s826_s27 }
 0x101   :  { %v285_v19 = vadd.f32 %v269_v42, %v142_v12  ;;  %v330_v42 = vmul.f32 %v314_v24, %v314_v24  ;;  %v322_v43 = vmul.f32 %v306_v23, %v306_v23  ;;  %v294_v44 = vadd.f32 %v741_v5, %v278_v22 }
 0x102   :  { %v346_v26 = vsel %vm336_vm0, %v323_v9, 0.0  ;;  %v309_v32 = vadd.f32 %v1060_v11, %v286_v10  ;;  %v370_v34 = vsel %vm336_vm0, %v331_v13, 0.0  ;;  %v293_v45 = vadd.f32 %v277_v28, %v182_v15  ;;  %p833_p3 = por %p832_p2, %p831_p1 }
 0x103   :  { %338 = vadd.xlane.f32.xlu0 %v337_v25  ;;  %347 = vadd.xlane.f32.xlu1 %v346_v26  ;;  %v732_v27 = vpop.f32.mrb[6].mxu0  ;;  %v744_v29 = vpop.f32.mrb[6].mxu1  ;;  %v308_v33 = vadd.f32 %v1060_v11, %v285_v19  ;;  %v280_v46 = vsub.f32 %v248_v30, %v264_v37  ;;  %v279_v47 = vsub.f32 %v247_v31, %v263_v39  ;;  %v367_v52 = vsel %vm336_vm0, %v330_v42, 0.0 }
 0x104   :  { %v288_v35 = vadd.f32 %v732_v27, %v272_v14  ;;  %v152_v36 = vpop.f32.mrb[7].mxu0  ;;  %v192_v38 = vpop.f32.mrb[7].mxu1  ;;  %v325_v50 = vmul.f32 %v309_v32, %v309_v32  ;;  %v343_v53 = vsel %vm336_vm0, %v322_v43, 0.0  ;;  %v317_v54 = vadd.f32 %v1060_v11, %v294_v44  ;;  %p834_p4 = pnand %p833_p3, %p827_p0 }
 0x105   :  { %v287_v40 = vadd.f32 %v271_v21, %v152_v36  ;;  %v324_v51 = vmul.f32 %v308_v33, %v308_v33  ;;  %v316_v55 = vadd.f32 %v1060_v11, %v293_v45  ;;  %v296_v56 = vadd.f32 %v744_v29, %v280_v46 }
 0x106   :  { %v311_v48 = vadd.f32 %v1060_v11, %v288_v35  ;;  %v295_v57 = vadd.f32 %v279_v47, %v192_v38  ;;  %v352_v58 = vsel %vm336_vm0, %v325_v50, 0.0  ;;  %v333_v62 = vmul.f32 %v317_v54, %v317_v54 }
 0x107   :  { %362 = vadd.xlane.f32.xlu0 %v361_v41  ;;  %371 = vadd.xlane.f32.xlu1 %v370_v34  ;;  %v310_v49 = vadd.f32 %v1060_v11, %v287_v40  ;;  %v349_v59 = vsel %vm336_vm0, %v324_v51, 0.0  ;;  %v332_v63 = vmul.f32 %v316_v55, %v316_v55  ;;  %v319_v0 = vadd.f32 %v1060_v11, %v296_v56 }
 0x108   :  { %v327_v60 = vmul.f32 %v311_v48, %v311_v48  ;;  %v318_v1 = vadd.f32 %v1060_v11, %v295_v57  ;;  %v376_v4 = vsel %vm336_vm0, %v333_v62, 0.0  ;;  %v529_v11 = vlaneseq }
 0x109   :  { %v326_v61 = vmul.f32 %v310_v49, %v310_v49  ;;  %v373_v5 = vsel %vm336_vm0, %v332_v63, 0.0  ;;  %v335_v6 = vmul.f32 %v319_v0, %v319_v0 }
 0x10a   :  { %v358_v2 = vsel %vm336_vm0, %v327_v60, 0.0  ;;  %v334_v7 = vmul.f32 %v318_v1, %v318_v1  ;;  %v1172_v10 = vand.u32 127, %v529_v11  ;;  %v1179_v14 = vshrl.u32 %v529_v11, 7 }
 0x10b   :  { %368 = vadd.xlane.f32.xlu0 %v367_v52  ;;  %344 = vadd.xlane.f32.xlu1 %v343_v53  ;;  %v355_v3 = vsel %vm336_vm0, %v326_v61, 0.0  ;;  %v382_v8 = vsel %vm336_vm0, %v335_v6, 0.0 }
 0x10c   :  { %v379_v9 = vsel %vm336_vm0, %v334_v7, 0.0  ;;  %v1182_v15 = vadd.s32 4294967224, %v1172_v10  ;;  %v1186_v16 = vadd.s32 4294967288, %v1172_v10  ;;  %v1194_v19 = vadd.s32 4294967272, %v1172_v10 }
 0x10d   :  { %v1200_v21 = vadd.s32 4294967232, %v1172_v10  ;;  %v1203_v22 = vadd.s32 4294967216, %v1172_v10  ;;  %v1208_v24 = vadd.s32 4294967280, %v1172_v10  ;;  %v1211_v25 = vadd.s32 4294967256, %v1172_v10 }
 0x10e   :  { %v594_v20 = vsub.s32 %v1182_v15, %v1179_v14  ;;  %v538_v23 = vsub.s32 %v1186_v16, %v1179_v14  ;;  %v1214_v26 = vadd.s32 4294967208, %v1172_v10  ;;  %v533_v27 = vsub.s32 %v1172_v10, %v1179_v14 }
 0x10f   :  { %353 = vadd.xlane.f32.xlu1 %v352_v58  ;;  %350 = vadd.xlane.f32.xlu0 %v349_v59  ;;  %v1223_v30 = vadd.s32 4294967264, %v1172_v10  ;;  %v1226_v31 = vadd.s32 4294967240, %v1172_v10  ;;  %v1229_v32 = vadd.s32 4294967248, %v1172_v10  ;;  %v552_v33 = vsub.s32 %v1194_v19, %v1179_v14 }
 0x110   :  { %v1235_v34 = vadd.s32 4294967200, %v1172_v10  ;;  %v1238_v35 = vadd.s32 4294967192, %v1172_v10  ;;  %v587_v36 = vsub.s32 %v1200_v21, %v1179_v14  ;;  %v601_v37 = vsub.s32 %v1203_v22, %v1179_v14 }
 0x111   :  { %v1245_v38 = vadd.s32 4294967184, %v1172_v10  ;;  %v1248_v39 = vadd.s32 4294967176, %v1172_v10  ;;  %v545_v41 = vsub.s32 %v1208_v24, %v1179_v14  ;;  %v566_v42 = vsub.s32 %v1211_v25, %v1179_v14 }
 0x112   :  { %v608_v43 = vsub.s32 %v1214_v26, %v1179_v14  ;;  %v559_v48 = vsub.s32 %v1223_v30, %v1179_v14  ;;  %v580_v49 = vsub.s32 %v1226_v31, %v1179_v14  ;;  %v573_v50 = vsub.s32 %v1229_v32, %v1179_v14 }
 0x113   :  { %359 = vadd.xlane.f32.xlu1 %v358_v2  ;;  %356 = vadd.xlane.f32.xlu0 %v355_v3  ;;  %v615_v52 = vsub.s32 %v1235_v34, %v1179_v14  ;;  %v622_v53 = vsub.s32 %v1238_v35, %v1179_v14  ;;  %v629_v54 = vsub.s32 %v1245_v38, %v1179_v14 }
 0x114   :  { %v636_v55 = vsub.s32 %v1248_v39, %v1179_v14 }
 0x117   :  { %377 = vadd.xlane.f32.xlu1 %v376_v4  ;;  %374 = vadd.xlane.f32.xlu0 %v373_v5 }
 0x11b   :  { %383 = vadd.xlane.f32.xlu1 %v382_v8  ;;  %380 = vadd.xlane.f32.xlu0 %v379_v9 }
 0x18c   :  { %v1174_v12 = vpop.xlane.xlu1 %365  ;;  %v1176_v13 = vpop.xlane.xlu0 %341 }
 0x18d   :  { %794 = vrsqrt.f32 %v1174_v12  ;;  %vm450_vm1 = vcmp.eq.f32.partialorder %v1174_v12, inf  ;;  %vm452_vm2 = vcmp.eq.f32.partialorder %v1174_v12, 0.0  ;;  %v453_v58 = vand.u32 2147483648, %v1174_v12 }
 0x18e   :  { %796 = vrsqrt.f32 %v1176_v13  ;;  %vm394_vm3 = vcmp.eq.f32.partialorder %v1176_v13, inf  ;;  %vm396_vm4 = vcmp.eq.f32.partialorder %v1176_v13, 0.0  ;;  %v397_v61 = vand.u32 2147483648, %v1176_v13 }
 0x190   :  { %v1188_v17 = vpop.xlane.xlu0 %338  ;;  %v1190_v18 = vpop.xlane.xlu1 %347 }
 0x191   :  { %798 = vrsqrt.f32 %v1188_v17  ;;  %vm387_vm5 = vcmp.eq.f32.partialorder %v1188_v17, inf  ;;  %vm389_vm6 = vcmp.eq.f32.partialorder %v1188_v17, 0.0  ;;  %v390_v3 = vand.u32 2147483648, %v1188_v17 }
 0x192   :  { %800 = vrsqrt.f32 %v1190_v18  ;;  %vm408_vm7 = vcmp.eq.f32.partialorder %v1190_v18, inf  ;;  %vm410_vm8 = vcmp.eq.f32.partialorder %v1190_v18, 0.0  ;;  %v411_v7 = vand.u32 2147483648, %v1190_v18 }
 0x194   :  { %v1218_v28 = vpop.xlane.xlu0 %362  ;;  %v1220_v29 = vpop.xlane.xlu1 %371 }
 0x195   :  { %802 = vrsqrt.f32 %v1218_v28  ;;  %vm443_vm9 = vcmp.eq.f32.partialorder %v1218_v28, inf  ;;  %vm445_vm10 = vcmp.eq.f32.partialorder %v1218_v28, 0.0  ;;  %vm464_vm11 = vcmp.eq.f32.partialorder %v1220_v29, inf }
 0x196   :  { %804 = vrsqrt.f32 %v1220_v29  ;;  %vm466_vm13 = vcmp.eq.f32.partialorder %v1220_v29, 0.0 }
 0x197   :  { %v795_v40 = vpop.eup %794 }
 0x198   :  { %v797_v44 = vpop.eup %796  ;;  %v449_v45 = vmul.f32 %v795_v40, %v1174_v12  ;;  %v1258_v46 = vpop.xlane.xlu0 %368 }
 0x199   :  { %v1260_v47 = vpop.xlane.xlu1 %344  ;;  %v393_v51 = vmul.f32 %v797_v44, %v1176_v13  ;;  %806 = vrsqrt.f32 %v1258_v46  ;;  %v446_v44 = vand.u32 2147483648, %v1218_v28  ;;  %vm457_vm14 = vcmp.eq.f32.partialorder %v1258_v46, inf }
 0x19a   :  { %808 = vrsqrt.f32 %v1260_v47  ;;  %v451_v57 = vsel %vm450_vm1, %v1174_v12, %v449_v45  ;;  %v467_v45 = vand.u32 2147483648, %v1220_v29  ;;  %vm401_vm15 = vcmp.eq.f32.partialorder %v1260_v47, inf }
 0x19b   :  { %v799_v56 = vpop.eup %798  ;;  %v395_v60 = vsel %vm394_vm3, %v1176_v13, %v393_v51  ;;  %v454_v2 = vsel %vm452_vm2, %v453_v58, %v451_v57  ;;  %vm403_vm0 = vcmp.eq.f32.partialorder %v1260_v47, 0.0  ;;  %vm547_vm2 = vcmask 195712  }
 0x19c   :  { %v801_v59 = vpop.eup %800  ;;  %v386_v62 = vmul.f32 %v799_v56, %v1188_v17  ;;  %v1290_v0 = vpop.xlane.xlu0 %350  ;;  %v398_v5 = vsel %vm396_vm4, %v397_v61, %v395_v60  ;;  %v506_v40 = vsub.f32 0.0, %v454_v2  ;;  %vm459_vm3 = vcmp.eq.f32.partialorder %v1258_v46, 0.0 }
 0x19d   :  { %v1288_v63 = vpop.xlane.xlu1 %353  ;;  %v407_v1 = vmul.f32 %v801_v59, %v1190_v18  ;;  %v498_v51 = vsub.f32 0.0, %v398_v5  ;;  %v460_v59 = vand.u32 2147483648, %v1258_v46 }
 0x19e   :  { %810 = vrsqrt.f32 %v1288_v63  ;;  %v388_v6 = vsel %vm387_vm5, %v1188_v17, %v386_v62  ;;  %v404_v62 = vand.u32 2147483648, %v1260_v47  ;;  %vm422_vm1 = vcmp.eq.f32.partialorder %v1288_v63, inf }
 0x19f   :  { %v803_v4 = vpop.eup %802  ;;  %812 = vrsqrt.f32 %v1290_v0  ;;  %v409_v8 = vsel %vm408_vm7, %v1190_v18, %v407_v1  ;;  %v391_v56 = vsel %vm389_vm6, %v390_v3, %v388_v6  ;;  %v1334_v18 = vrot.slane %v506_v40, %v594_v20 }
 0x1a0   :  { %v442_v9 = vmul.f32 %v803_v4, %v1218_v28  ;;  %v1308_v12 = vpop.xlane.xlu0 %356  ;;  %v805_v13 = vpop.eup %804  ;;  %v412_v58 = vsel %vm410_vm8, %v411_v7, %v409_v8  ;;  %v497_v2 = vsub.f32 0.0, %v391_v56  ;;  %v539_v4 = vrot.slane %v498_v51, %v538_v23 }
 0x1a1   :  { %v1306_v11 = vpop.xlane.xlu1 %359  ;;  %v463_v61 = vmul.f32 %v805_v13, %v1220_v29  ;;  %v500_v5 = vsub.f32 0.0, %v412_v58  ;;  %vm424_vm4 = vcmp.eq.f32.partialorder %v1288_v63, 0.0  ;;  %v425_v6 = vand.u32 2147483648, %v1288_v63 }
 0x1a2   :  { %814 = vrsqrt.f32 %v1306_v11  ;;  %v444_v17 = vsel %vm443_vm9, %v1218_v28, %v442_v9  ;;  %vm554_vm5 = vcmask 261312   ;;  %vm415_vm6 = vcmp.eq.f32.partialorder %v1290_v0, inf }
 0x1a3   :  { %v807_v57 = vpop.eup %806  ;;  %816 = vrsqrt.f32 %v1308_v12  ;;  %v447_v7 = vsel %vm445_vm10, %v446_v44, %v444_v17  ;;  %v465_v23 = vsel %vm464_vm11, %v1220_v29, %v463_v61  ;;  %v534_v40 = vrot.slane %v497_v2, %v533_v27 }
 0x1a4   :  { %v809_v60 = vpop.eup %808  ;;  %v1344_v15 = vpop.xlane.xlu0 %374  ;;  %v456_v8 = vmul.f32 %v807_v57, %v1258_v46  ;;  %vm561_vm7 = vcmask 326912   ;;  %vm417_vm8 = vcmp.eq.f32.partialorder %v1290_v0, 0.0  ;;  %v418_v58 = vand.u32 2147483648, %v1290_v0 }
 0x1a5   :  { %v1329_v1 = vpop.xlane.xlu1 %377  ;;  %v400_v3 = vmul.f32 %v809_v60, %v1260_v47  ;;  %v553_v10 = vrot.slane %v500_v5, %v552_v33  ;;  %v1377_v27 = vsel %vm466_vm13, %v467_v45, %v465_v23  ;;  %vm436_vm9 = vcmp.eq.f32.partialorder %v1306_v11, inf }
 0x1a6   :  { %818 = vrsqrt.f32 %v1329_v1  ;;  %v458_v60 = vsel %vm457_vm14, %v1258_v46, %v456_v8  ;;  %vm568_vm10 = vcmask 392512   ;;  %v541_v33 = vsel %vm540_vm12, %v539_v4, %v534_v40 }
 0x1a7   :  { %v402_v16 = vsel %vm401_vm15, %v1260_v47, %v400_v3  ;;  %820 = vrsqrt.f32 %v1344_v15  ;;  %v505_v47 = vsub.f32 0.0, %v447_v7  ;;  %vm438_vm11 = vcmp.eq.f32.partialorder %v1306_v11, 0.0 }
 0x1a8   :  { %v811_v20 = vpop.eup %810  ;;  %v405_v9 = vsel %vm403_vm0, %v404_v62, %v402_v16  ;;  %v1392_v29 = vpop.xlane.xlu0 %380  ;;  %vm575_vm13 = vcmask 458112   ;;  %v439_v3 = vand.u32 2147483648, %v1306_v11  ;;  %vm582_vm14 = vcmask 523712  }
 0x1a9   :  { %v421_v13 = vmul.f32 %v811_v20, %v1288_v63  ;;  %v813_v28 = vpop.eup %812  ;;  %v499_v44 = vsub.f32 0.0, %v405_v9  ;;  %v1365_v51 = vpop.xlane.xlu1 %383  ;;  %vm589_vm12 = vcmask 589312   ;;  %vm596_vm15 = vcmask 654912  }
 0x1aa   :  { %v414_v57 = vmul.f32 %v813_v28, %v1290_v0  ;;  %822 = vrsqrt.f32 %v1365_v51  ;;  %vm429_vm0 = vcmp.eq.f32.partialorder %v1308_v12, inf  ;;  %v481_v28 = vand.u32 2147483648, %v1329_v1 }
 0x1ab   :  { %v423_v56 = vsel %vm422_vm1, %v1288_v63, %v421_v13  ;;  %v546_v61 = vrot.slane %v499_v44, %v545_v41  ;;  %v1402_v41 = vrot.slane %v505_v47, %v587_v36  ;;  %v508_v63 = vsub.f32 0.0, %v1377_v27 }
 0x1ac   :  { %v815_v17 = vpop.eup %814  ;;  %v426_v62 = vsel %vm424_vm4, %v425_v6, %v423_v56  ;;  %v416_v19 = vsel %vm415_vm6, %v1290_v0, %v414_v57  ;;  %v461_v0 = vsel %vm459_vm3, %v460_v59, %v458_v60  ;;  %824 = vrsqrt.f32 %v1392_v29 }
 0x1ad   :  { %v419_v45 = vsel %vm417_vm8, %v418_v58, %v416_v19  ;;  %v435_v24 = vmul.f32 %v815_v17, %v1306_v11  ;;  %v817_v4 = vpop.eup %816  ;;  %v502_v5 = vsub.f32 0.0, %v426_v62  ;;  %v548_v21 = vsel %vm547_vm2, %v546_v61, %v541_v33 }
 0x1ae   :  { %v501_v2 = vsub.f32 0.0, %v419_v45  ;;  %v428_v7 = vmul.f32 %v817_v4, %v1308_v12  ;;  %vm431_vm1 = vcmp.eq.f32.partialorder %v1308_v12, 0.0  ;;  %vm603_vm3 = vcmask 720512  }
 0x1af   :  { %v437_v6 = vsel %vm436_vm9, %v1306_v11, %v435_v24  ;;  %v432_v11 = vand.u32 2147483648, %v1308_v12  ;;  %v507_v8 = vsub.f32 0.0, %v461_v0  ;;  %vm478_vm2 = vcmp.eq.f32.partialorder %v1329_v1, inf }
 0x1b0   :  { %v560_v36 = vrot.slane %v501_v2, %v559_v48  ;;  %v440_v20 = vsel %vm438_vm11, %v439_v3, %v437_v6  ;;  %v819_v46 = vpop.eup %818  ;;  %v430_v16 = vsel %vm429_vm0, %v1308_v12, %v428_v7  ;;  %vm610_vm4 = vcmask 786112  }
 0x1b1   :  { %v504_v59 = vsub.f32 0.0, %v440_v20  ;;  %v477_v23 = vmul.f32 %v819_v46, %v1329_v1  ;;  %v821_v30 = vpop.eup %820  ;;  %v567_v48 = vrot.slane %v502_v5, %v566_v42  ;;  %v555_v9 = vsel %vm554_vm5, %v553_v10, %v548_v21 }
 0x1b2   :  { %v433_v13 = vsel %vm431_vm1, %v432_v11, %v430_v16  ;;  %vm617_vm6 = vcmask 851712   ;;  %v562_v40 = vsel %vm561_vm7, %v560_v36, %v555_v9  ;;  %v470_v47 = vmul.f32 %v821_v30, %v1344_v15 }
 0x1b3   :  { %v503_v44 = vsub.f32 0.0, %v433_v13  ;;  %v479_v12 = vsel %vm478_vm2, %v1329_v1, %v477_v23  ;;  %vm624_vm8 = vcmask 917312   ;;  %v581_v56 = vrot.slane %v504_v59, %v580_v49 }
 0x1b4   :  { %vm480_vm9 = vcmp.eq.f32.partialorder %v1329_v1, 0.0  ;;  %vm471_vm5 = vcmp.eq.f32.partialorder %v1344_v15, inf  ;;  %v474_v25 = vand.u32 2147483648, %v1344_v15  ;;  %v823_v42 = vpop.eup %822  ;;  %vm473_vm7 = vcmp.eq.f32.partialorder %v1344_v15, 0.0 }
 0x1b5   :  { %v574_v57 = vrot.slane %v503_v44, %v573_v50  ;;  %v472_v58 = vsel %vm471_vm5, %v1344_v15, %v470_v47  ;;  %v482_v10 = vsel %vm480_vm9, %v481_v28, %v479_v12  ;;  %v602_v31 = vrot.slane %v507_v8, %v601_v37 }
 0x1b6   :  { %v569_v49 = vsel %vm568_vm10, %v567_v48, %v562_v40  ;;  %v475_v1 = vsel %vm473_vm7, %v474_v25, %v472_v58  ;;  %v491_v60 = vmul.f32 %v823_v42, %v1365_v51  ;;  %vm492_vm11 = vcmp.eq.f32.partialorder %v1365_v51, inf  ;;  %v825_v50 = vpop.eup %824 }
 0x1b7   :  { %v576_v17 = vsel %vm575_vm13, %v574_v57, %v569_v49  ;;  %v509_v61 = vsub.f32 0.0, %v475_v1  ;;  %v495_v32 = vand.u32 2147483648, %v1365_v51  ;;  %vm494_vm0 = vcmp.eq.f32.partialorder %v1365_v51, 0.0 }
 0x1b8   :  { %v493_v15 = vsel %vm492_vm11, %v1365_v51, %v491_v60  ;;  %v510_v62 = vsub.f32 0.0, %v482_v10  ;;  %v583_v22 = vsel %vm582_vm14, %v581_v56, %v576_v17  ;;  %v484_v37 = vmul.f32 %v825_v50, %v1392_v29 }
 0x1b9   :  { %vm485_vm10 = vcmp.eq.f32.partialorder %v1392_v29, inf  ;;  %v496_v19 = vsel %vm494_vm0, %v495_v32, %v493_v15  ;;  %v590_v33 = vsel %vm589_vm12, %v1402_v41, %v583_v22  ;;  %v488_v45 = vand.u32 2147483648, %v1392_v29 }
 0x1ba   :  { %v512_v24 = vsub.f32 0.0, %v496_v19  ;;  %v597_v2 = vsel %vm596_vm15, %v1334_v18, %v590_v33  ;;  %v609_v51 = vrot.slane %v508_v63, %v608_v43  ;;  %v486_v3 = vsel %vm485_vm10, %v1392_v29, %v484_v37 }
 0x1bb   :  { %vm487_vm13 = vcmp.eq.f32.partialorder %v1392_v29, 0.0  ;;  %v604_v4 = vsel %vm603_vm3, %v602_v31, %v597_v2  ;;  %v616_v41 = vrot.slane %v509_v61, %v615_v52  ;;  %v623_v26 = vrot.slane %v510_v62, %v622_v53 }
 0x1bc   :  { %v489_v0 = vsel %vm487_vm13, %v488_v45, %v486_v3  ;;  %v611_v5 = vsel %vm610_vm4, %v609_v51, %v604_v4  ;;  %vm631_vm14 = vcmask 982912   ;;  %v637_v29 = vrot.slane %v512_v24, %v636_v55 }
 0x1bd   :  { %v511_v18 = vsub.f32 0.0, %v489_v0  ;;  %v618_v43 = vsel %vm617_vm6, %v616_v41, %v611_v5  ;;  %vm638_vm12 = vcmask 1048512  }
 0x1be   :  { %v625_v27 = vsel %vm624_vm8, %v623_v26, %v618_v43 }
 0x1bf   :  { %v630_v34 = vrot.slane %v511_v18, %v629_v54 }
 0x1c1   :  { %v632_v52 = vsel %vm631_vm14, %v630_v34, %v625_v27 }
 0x1c2   :  { %v639_v35 = vsel %vm638_vm12, %v637_v29, %v632_v52 }
 0x1c3   :  { %641 = vst [vmem:[#allocation2] sm:$0x1] %v639_v35 }
 0x1c4   :  { %837 = shalt.err (!%p834_p4)
}
 0x1c5   :  { %s838_s7 = scalar_lea.hbm %s1503_s6, 16 }
 0x1c6   :  { %p839_p5 = scmp.ne.s32.totalorder %s1503_s6, %s838_s7  ;;  %p842_p6 = scmp.lt.u32.totalorder %s838_s7, %s1503_s6 }
 0x1c8   :  { %p844_p7 = pnand %p842_p6, %p839_p5 }
 0x1ca   :  { %847 = shalt.err (!%p844_p7)
}
 0x1cb   :  { %651 = dma.vmem_to_hbm [thread:$0]  %s649_s26, 16, %s1503_s6, [#allocation3]  }
 0x1cc   :  { %848 = dma.done.wait [#allocation3], 16  }
 0x1cd   :  { %849 = vsyncadd [#allocation3], 4294967280 }
 0x1ce   :  { %655 = vsyncpa [#allocation3], 1 }

</bundles_post_ra>
